<compile_context>
chip_gen: v5e
topology: v5e:2x2
jax: 0.10.0
libtpu: 0.0.40
codegen_flags: <defaults>
</compile_context>

<pallas_src>
import jax
import jax.numpy as jnp
from jax.experimental import pallas as pl
from jax.experimental.pallas import tpu as pltpu


def _normalize_kernel(x_ref, neg_mean_ref, inv_std_ref, o_ref):
    # x_ref / o_ref: (TM, TW) lane-dense tiles.
    # neg_mean_ref / inv_std_ref: (TM, 1) f32 per-row constants, broadcast over lanes.
    # Compute in f32, cast once at the store.
    x = x_ref[...].astype(jnp.float32)
    o_ref[...] = ((x + neg_mean_ref[...]) * inv_std_ref[...]).astype(o_ref.dtype)


def _choose_tiles(rows, cols, itemsize):
    """Pick (TM, TW): lane-dense, ~6 MiB blocks, dtype-aware sublane rounding,
    and at least 2 blocks for >1 MiB slabs (megacore)."""
    LANE = 128
    sub_mult = 8 * max(1, 4 // itemsize)  # 8 (f32), 16 (bf16/f16), 32 (int8/fp8)
    cap = 16384

    # Lane tile: full width if it fits; otherwise the largest multiple of 128
    # <= cap that divides cols evenly (no ragged masked-store edge block);
    # fall back to cap if no such divisor exists.
    if cols <= cap:
        tw = cols
    else:
        tw = cap
        for cand in range(cap, LANE - 1, -LANE):
            if cols % cand == 0:
                tw = cand
                break

    # Sublane tile: target ~6 MiB per block.
    target_elems = (6 * 1024 * 1024) // itemsize
    tm = max(1, target_elems // max(tw, 1))
    if tm >= rows:
        tm = rows
    else:
        tm = max(sub_mult, (tm // sub_mult) * sub_mult)

    # Megacore: make sure a >~1 MiB slab produces at least 2 parallel blocks.
    slab_bytes = rows * cols * itemsize
    if slab_bytes > (1 << 20) and pl.cdiv(rows, tm) * pl.cdiv(cols, tw) == 1:
        if tw >= 2 * LANE:
            tw = ((tw // 2 + LANE - 1) // LANE) * LANE
        elif tm >= 2 * sub_mult:
            tm = max(sub_mult, ((tm // 2) // sub_mult) * sub_mult)

    return tm, tw


def normalization_forward(img, mean, std, *, force_pallas=False):
    """Pallas equivalent of Normalization.forward:
       (img - mean[:, None, None]) / std[:, None, None]  for NCHW `img`."""
    N, C, H, W = img.shape
    dtype = img.dtype
    rows, cols = N * C, H * W
    itemsize = jnp.dtype(dtype).itemsize

    mean = jnp.asarray(mean, dtype=jnp.float32).reshape(-1)
    std = jnp.asarray(std, dtype=jnp.float32).reshape(-1)

    # Small-input fallback: the kernel would be pure launch/pipeline overhead.
    if rows * cols * itemsize < (1 << 20) and not force_pallas:
        return ((img - mean.reshape(1, C, 1, 1)) / std.reshape(1, C, 1, 1)).astype(dtype)

    # Per-row affine constants (one row per (n, c) plane), kept in exact fp32.
    # The division happens once here, outside the streaming kernel.
    neg_mean_rows = jnp.tile(-mean, N).reshape(rows, 1)
    inv_std_rows = jnp.tile(1.0 / std, N).reshape(rows, 1)

    # Lane-dense flattening: (N, C, H, W) -> (N*C, H*W). Copy-free for
    # contiguous NCHW inputs.
    x2d = img.reshape(rows, cols)

    tm, tw = _choose_tiles(rows, cols, itemsize)
    grid = (pl.cdiv(rows, tm), pl.cdiv(cols, tw))

    out2d = pl.pallas_call(
        _normalize_kernel,
        out_shape=jax.ShapeDtypeStruct((rows, cols), dtype),
        grid=grid,
        in_specs=[
            pl.BlockSpec((tm, tw), lambda i, j: (i, j)),   # image slab
            pl.BlockSpec((tm, 1), lambda i, j: (i, 0)),    # -mean per row (f32)
            pl.BlockSpec((tm, 1), lambda i, j: (i, 0)),    # 1/std per row (f32)
        ],
        out_specs=pl.BlockSpec((tm, tw), lambda i, j: (i, j)),
        compiler_params=pltpu.CompilerParams(
            dimension_semantics=("parallel", "parallel"),
            # ~6 MiB blocks double-buffered (in + out) ~= 24 MiB; raise the
            # scoped-VMEM limit so v5e (16 MiB default) keeps large blocks
            # while staying well under v7x's 64 MiB physical VMEM.
            vmem_limit_bytes=40 * 1024 * 1024,
        ),
        cost_estimate=pl.CostEstimate(
            flops=2 * rows * cols,
            transcendentals=0,
            bytes_accessed=2 * rows * cols * itemsize,
        ),
    )(x2d, neg_mean_rows, inv_std_rows)

    return out2d.reshape(N, C, H, W)


if __name__ == "__main__":
    # Deterministic parameters: the classic ImageNet normalization constants
    # used by the style-transfer example (viewed as (C,1,1) in PyTorch).
    mean = jnp.array([0.485, 0.456, 0.406], dtype=jnp.float32)
    std = jnp.array([0.229, 0.224, 0.225], dtype=jnp.float32)

    # Small NCHW input consistent with the module: batch=2, channels=3, 16x16.
    key = jax.random.PRNGKey(0)
    img = jax.random.uniform(key, (2, 3, 16, 16), dtype=jnp.float32)

    # force_pallas=True so the Pallas kernel itself runs even at demo size
    # (the wrapper would otherwise take the small-input jnp fallback).
    out = normalization_forward(img, mean, std, force_pallas=True)
    out = jax.block_until_ready(out)

    # Reference: plain JAX broadcasting semantics (== PyTorch semantics).
    ref = (img - mean.reshape(-1, 1, 1)) / std.reshape(-1, 1, 1)
    assert out.shape == img.shape
    # Multiply-by-precomputed-fp32-reciprocal differs from true division by ~1-2 ulp.
    assert jnp.allclose(out, ref, atol=1e-6, rtol=1e-5)

    print("KERNEL_OK")
</pallas_src>

<mosaic_0001>
module attributes {stable_mosaic.version = 11 : i64} {
  func.func @_normalize_kernel(%arg0: i32, %arg1: i32, %arg2: memref<6x256xf32, #tpu.memory_space<vmem>>, %arg3: memref<6x1xf32, #tpu.memory_space<vmem>>, %arg4: memref<6x1xf32, #tpu.memory_space<vmem>>, %arg5: memref<6x256xf32, #tpu.memory_space<vmem>>) attributes {dimension_semantics = [#tpu.dimension_semantics<parallel>, #tpu.dimension_semantics<parallel>], iteration_bounds = array<i64: 1, 1>, scalar_prefetch = 0 : i64, scratch_operands = 0 : i64, tpu.core_type = #tpu.core_type<tc>, window_params = [{transform_indices = @transform_0, window_bounds = array<i64: 6, 256>}, {transform_indices = @transform_1, window_bounds = array<i64: 6, 1>}, {transform_indices = @transform_2, window_bounds = array<i64: 6, 1>}, {transform_indices = @transform_3, window_bounds = array<i64: 6, 256>}]} {
    %c0 = arith.constant 0 : index
    %c0_0 = arith.constant 0 : index
    %0 = vector.load %arg2[%c0, %c0_0] : memref<6x256xf32, #tpu.memory_space<vmem>>, vector<6x256xf32>
    %c0_1 = arith.constant 0 : index
    %c0_2 = arith.constant 0 : index
    %1 = vector.load %arg3[%c0_1, %c0_2] : memref<6x1xf32, #tpu.memory_space<vmem>>, vector<6x1xf32>
    %2 = vector.broadcast %1 : vector<6x1xf32> to vector<6x256xf32>
    %3 = arith.addf %0, %2 : vector<6x256xf32>
    %c0_3 = arith.constant 0 : index
    %c0_4 = arith.constant 0 : index
    %4 = vector.load %arg4[%c0_3, %c0_4] : memref<6x1xf32, #tpu.memory_space<vmem>>, vector<6x1xf32>
    %5 = vector.broadcast %4 : vector<6x1xf32> to vector<6x256xf32>
    %6 = arith.mulf %3, %5 : vector<6x256xf32>
    %c0_5 = arith.constant 0 : index
    %c0_6 = arith.constant 0 : index
    %7 = vector.load %arg5[%c0_5, %c0_6] : memref<6x256xf32, #tpu.memory_space<vmem>>, vector<6x256xf32>
    tpu.vector_store %arg5[%c0_5, %c0_6], %6 {strides = array<i32>} : memref<6x256xf32, #tpu.memory_space<vmem>>, vector<6x256xf32>,
    return
  }
  func.func @transform_0(%arg0: i32, %arg1: i32) -> (i32, i32) {
    %c0_i32 = arith.constant 0 : i32
    return %arg0, %arg1 : i32, i32
  }
  func.func @transform_1(%arg0: i32, %arg1: i32) -> (i32, i32) {
    %c0_i32 = arith.constant 0 : i32
    %c0_i32_0 = arith.constant 0 : i32
    return %arg0, %c0_i32 : i32, i32
  }
  func.func @transform_2(%arg0: i32, %arg1: i32) -> (i32, i32) {
    %c0_i32 = arith.constant 0 : i32
    %c0_i32_0 = arith.constant 0 : i32
    return %arg0, %c0_i32 : i32, i32
  }
  func.func @transform_3(%arg0: i32, %arg1: i32) -> (i32, i32) {
    %c0_i32 = arith.constant 0 : i32
    return %arg0, %arg1 : i32, i32
  }
}

</mosaic_0001>

<bundles_post_ra>
// kernel: tpu_custom_call.1
= control target key start
LH: loop header
LB: loop body
LE: loop exit
PB: predicated region body
PF: predicated region fallthrough
CT: control target
= control target key end

     0   :  { %v80_v1 = vmov 0   ;;  %s117_s0 = inlined_call_operand.vmem [shape: f32[6,256], index: 0, kind: input, shape index: {}]   ;;  %s118_s1 = inlined_call_operand.vmem [shape: f32[6,1], index: 1, kind: input, shape index: {}]   ;;  %s119_s2 = inlined_call_operand.vmem [shape: f32[6,1], index: 2, kind: input, shape index: {}]   ;;  %s120_s3 = inlined_call_operand.hbm [shape: f32[6,256], index: 3, kind: output, shape index: {}]  }
   0x1   :  { %v17_v0 = vld [vmem:[%s118_s1] sm:$0x3f]  ;;  %53 = vset.pattern.permute.xlu0 %v80_v1 }
   0x2   :  { %8 = vsyncpa [#allocation3], 0  ;;  %20 = vperm.xlu0 %53, %v17_v0   ;;  %v25_v2 = vld [vmem:[%s119_s2] sm:$0x3f]  ;;  %v16_v5 = vld [vmem:[%s117_s0 + $0x8] sm:$0x3f] }
   0x3   :  { %v15_v4 = vld [vmem:[%s117_s0] sm:$0x3f]  ;;  %s81_s1 = smov [#allocation2]   ;;  %s42_s23 = sshll.u32 %s120_s3, 4  ;;  %s43_s23 = int_to_ptr.hbm [resolvable:$true] %s42_s23 }
   0x4   :  { %s40_s20 = sshll.u32 %s81_s1, 4  ;;  %s41_s20 = int_to_ptr.vmem [resolvable:$true] %s40_s20 }
   0xa   :  { %28 = vperm.xlu0 %53, %v25_v2  }
  0x74   :  { %v21_v3 = vpop.permute.xlu0 %20 }
  0x75   :  { %v23_v6 = vadd.f32 %v21_v3, %v15_v4  ;;  %v24_v7 = vadd.f32 %v21_v3, %v16_v5 }
  0x7c   :  { %v29_v8 = vpop.permute.xlu0 %28 }
  0x7d   :  { %v31_v9 = vmul.f32 %v29_v8, %v23_v6  ;;  %v32_v10 = vmul.f32 %v29_v8, %v24_v7 }
  0x7f   :  { %33 = vst [vmem:[#allocation2] sm:$0x3f] %v31_v9 }
  0x80   :  { %34 = vst [vmem:[#allocation2 + $0x8] sm:$0x3f] %v32_v10 }
  0x81   :  { %45 = dma.vmem_to_hbm [thread:$0]  %s41_s20, 256, %s43_s23, [#allocation3]  }
  0x82   :  { %78 = dma.done.wait [#allocation3], 256  }
  0x83   :  { %79 = vsyncadd [#allocation3], 4294967040 }
  0x84   :  { %50 = vsyncpa [#allocation3], 1 }

</bundles_post_ra>
